<compile_context>
chip_gen: v7x
topology: tpu7x:2x2x1
jax: 0.10.0
libtpu: 0.0.40
codegen_flags: <defaults>
</compile_context>

<pallas_src>
import jax
import jax.numpy as jnp
from jax.experimental import pallas as pl
from jax.experimental.pallas import tpu as pltpu

# ---- small-scale config (stands in for SimCLR defaults) ----
B, C_IN, H, W = 2, 4, 16, 16     # stands for [B, 3, 32, 32]
C_FEAT = 32                      # stands for resnet18 in_features = 512
HIDDEN = 32                      # hidden_dim (== in_features for resnet18 default)
PROJ = 16                        # projection_dim (stands for 128)
EPS = 1e-5                       # BatchNorm1d eps
K_RAW = 9 * C_IN                 # im2col contraction dim (3*3*C_in)
K_PAD = 128                      # contraction dim padded to a full lane width


# -------------------- fused Pallas kernel --------------------

def simclr_fused_kernel(patches_ref, pool_ref, w_conv_ref, b_conv_ref,
                        w_fc_ref, b_fc_ref, w1_ref, b1_ref, w2_ref, b2_ref,
                        gamma_ref, beta_ref, o_ref):
    """conv(im2col matmul)+ReLU -> global-avg-pool (matmul) -> fc -> proj head -> BN."""
    # --- encoder conv stem: bf16 MXU matmul, f32 accumulate, f32 bias+ReLU ---
    feat = jnp.dot(patches_ref[...], w_conv_ref[...],
                   preferred_element_type=jnp.float32)            # [B*HW, C_FEAT]
    feat = jnp.maximum(feat + b_conv_ref[...], 0.0)               # f32 elementwise

    # --- global average pool as an MXU matmul against a [B, B*HW] 1/HW selector ---
    pooled = jnp.dot(pool_ref[...], feat.astype(jnp.bfloat16),
                     preferred_element_type=jnp.float32)          # [B, C_FEAT]

    # --- encoder fc (resnet .fc replaced to output hidden_dim), no activation ---
    h = jnp.dot(pooled.astype(jnp.bfloat16), w_fc_ref[...],
                preferred_element_type=jnp.float32) + b_fc_ref[...]

    # --- projection head: Linear -> ReLU -> Linear -> BatchNorm1d (training stats) ---
    y = jnp.dot(h.astype(jnp.bfloat16), w1_ref[...],
                preferred_element_type=jnp.float32) + b1_ref[...]
    y = jnp.maximum(y, 0.0)
    y = jnp.dot(y.astype(jnp.bfloat16), w2_ref[...],
                preferred_element_type=jnp.float32) + b2_ref[...]

    # BatchNorm1d, training mode: biased batch statistics over the batch dim.
    mean = jnp.mean(y, axis=0, keepdims=True)
    var = jnp.mean((y - mean) ** 2, axis=0, keepdims=True)
    z = (y - mean) * jax.lax.rsqrt(var + EPS)
    o_ref[...] = gamma_ref[...] * z + beta_ref[...]


# -------------------- JAX glue --------------------

def im2col_3x3_padded(x_nchw):
    """NCHW -> 3x3/stride-1/pad-1 im2col patches [B*H*W, K_PAD] in bf16.

    Column ordering is (dh, dw, channel): col = (dh*3 + dw)*C_in + c. A PyTorch
    conv weight [C_out, C_in, kh, kw] must be permuted to [kh, kw, C_in, C_out]
    and reshaped to (9*C_in, C_out) to match.
    """
    b, c, h, w = x_nchw.shape
    x_nhwc = jnp.transpose(x_nchw, (0, 2, 3, 1))
    xp = jnp.pad(x_nhwc, ((0, 0), (1, 1), (1, 1), (0, 0)))
    cols = [xp[:, dh:dh + h, dw:dw + w, :] for dh in range(3) for dw in range(3)]
    patches = jnp.concatenate(cols, axis=-1).reshape(b * h * w, 9 * c)
    patches = jnp.pad(patches, ((0, 0), (0, K_PAD - 9 * c)))       # lane-dense K
    return patches.astype(jnp.bfloat16)


def make_pool_matrix(batch, hw):
    """[batch, batch*hw] selector with 1/hw on each sample's own spatial rows."""
    row_batch = jnp.arange(batch * hw, dtype=jnp.int32) // hw
    sel = (row_batch[None, :] == jnp.arange(batch, dtype=jnp.int32)[:, None])
    return (sel.astype(jnp.float32) / float(hw)).astype(jnp.bfloat16)


def simclr_forward(x, params):
    b, c, h, w = x.shape
    patches = im2col_3x3_padded(x)                                 # [B*HW, 128] bf16
    pool = make_pool_matrix(b, h * w)                              # [B, B*HW]  bf16

    # pad conv weight rows to K_PAD (zero rows contribute nothing), cast MXU inputs
    w_conv = jnp.pad(params["w_conv"], ((0, K_PAD - K_RAW), (0, 0))).astype(jnp.bfloat16)
    w_fc = params["w_fc"].astype(jnp.bfloat16)
    w1 = params["w1"].astype(jnp.bfloat16)
    w2 = params["w2"].astype(jnp.bfloat16)

    vmem = pl.BlockSpec(memory_space=pltpu.MemorySpace.VMEM)
    return pl.pallas_call(
        simclr_fused_kernel,
        out_shape=jax.ShapeDtypeStruct((b, PROJ), jnp.float32),
        in_specs=[vmem] * 12,
        out_specs=vmem,
        compiler_params=pltpu.CompilerParams(vmem_limit_bytes=32 << 20),
    )(patches, pool, w_conv, params["b_conv"],
      w_fc, params["b_fc"], w1, params["b1"], w2, params["b2"],
      params["gamma"], params["beta"])


def init_params(key):
    ks = jax.random.split(key, 6)
    scale = 0.1
    return {
        "w_conv": scale * jax.random.normal(ks[0], (K_RAW, C_FEAT), jnp.float32),
        "b_conv": jnp.zeros((1, C_FEAT), jnp.float32),
        "w_fc":   scale * jax.random.normal(ks[1], (C_FEAT, HIDDEN), jnp.float32),
        "b_fc":   scale * jax.random.normal(ks[2], (1, HIDDEN), jnp.float32),
        "w1":     scale * jax.random.normal(ks[3], (HIDDEN, HIDDEN), jnp.float32),
        "b1":     scale * jax.random.normal(ks[4], (1, HIDDEN), jnp.float32),
        "w2":     scale * jax.random.normal(ks[5], (HIDDEN, PROJ), jnp.float32),
        "b2":     jnp.zeros((1, PROJ), jnp.float32),
        "gamma":  jnp.ones((1, PROJ), jnp.float32),    # BatchNorm1d weight
        "beta":   jnp.zeros((1, PROJ), jnp.float32),   # BatchNorm1d bias
    }


if __name__ == "__main__":
    key = jax.random.PRNGKey(0)
    k_x, k_p = jax.random.split(key)
    x = jax.random.normal(k_x, (B, C_IN, H, W), jnp.float32)   # NCHW like PyTorch
    params = init_params(k_p)

    z = jax.jit(simclr_forward)(x, params)
    jax.block_until_ready(z)
    assert z.shape == (B, PROJ) and z.dtype == jnp.float32
    assert bool(jnp.all(jnp.isfinite(z)))
    print("KERNEL_OK")
</pallas_src>

<mosaic_0001>
module attributes {stable_mosaic.version = 11 : i64} {
  func.func @simclr_fused_kernel(%arg0: memref<512x128xbf16, #tpu.memory_space<vmem>>, %arg1: memref<2x512xbf16, #tpu.memory_space<vmem>>, %arg2: memref<128x32xbf16, #tpu.memory_space<vmem>>, %arg3: memref<1x32xf32, #tpu.memory_space<vmem>>, %arg4: memref<32x32xbf16, #tpu.memory_space<vmem>>, %arg5: memref<1x32xf32, #tpu.memory_space<vmem>>, %arg6: memref<32x32xbf16, #tpu.memory_space<vmem>>, %arg7: memref<1x32xf32, #tpu.memory_space<vmem>>, %arg8: memref<32x16xbf16, #tpu.memory_space<vmem>>, %arg9: memref<1x16xf32, #tpu.memory_space<vmem>>, %arg10: memref<1x16xf32, #tpu.memory_space<vmem>>, %arg11: memref<1x16xf32, #tpu.memory_space<vmem>>, %arg12: memref<2x16xf32, #tpu.memory_space<vmem>>) attributes {dimension_semantics = [], scalar_prefetch = 0 : i64, scratch_operands = 0 : i64, tpu.core_type = #tpu.core_type<tc>} {
    %c0 = arith.constant 0 : index
    %c0_0 = arith.constant 0 : index
    %0 = vector.load %arg0[%c0, %c0_0] : memref<512x128xbf16, #tpu.memory_space<vmem>>, vector<512x128xbf16>
    %c0_1 = arith.constant 0 : index
    %c0_2 = arith.constant 0 : index
    %1 = vector.load %arg2[%c0_1, %c0_2] : memref<128x32xbf16, #tpu.memory_space<vmem>>, vector<128x32xbf16>
    %cst = arith.constant dense<0.000000e+00> : vector<512x32xf32>
    %2 = tpu.matmul %0, %1, %cst {dimension_numbers = #tpu.dot_dimension_numbers<[1], [0], [0], [1], [0, 0, 1, 1], [], []>} : vector<512x128xbf16>, vector<128x32xbf16>, vector<512x32xf32> -> vector<512x32xf32>
    %c0_3 = arith.constant 0 : index
    %c0_4 = arith.constant 0 : index
    %3 = vector.load %arg3[%c0_3, %c0_4] : memref<1x32xf32, #tpu.memory_space<vmem>>, vector<1x32xf32>
    %4 = vector.broadcast %3 : vector<1x32xf32> to vector<512x32xf32>
    %5 = arith.addf %2, %4 : vector<512x32xf32>
    %cst_5 = arith.constant 0.000000e+00 : f32
    %6 = vector.broadcast %cst_5 : f32 to vector<512x32xf32>
    %7 = arith.maximumf %5, %6 : vector<512x32xf32>
    %c0_6 = arith.constant 0 : index
    %c0_7 = arith.constant 0 : index
    %8 = vector.load %arg1[%c0_6, %c0_7] : memref<2x512xbf16, #tpu.memory_space<vmem>>, vector<2x512xbf16>
    %9 = arith.truncf %7 : vector<512x32xf32> to vector<512x32xbf16>
    %cst_8 = arith.constant dense<0.000000e+00> : vector<2x32xf32>
    %10 = tpu.matmul %8, %9, %cst_8 {dimension_numbers = #tpu.dot_dimension_numbers<[1], [0], [0], [1], [0, 0, 1, 1], [], []>} : vector<2x512xbf16>, vector<512x32xbf16>, vector<2x32xf32> -> vector<2x32xf32>
    %11 = arith.truncf %10 : vector<2x32xf32> to vector<2x32xbf16>
    %c0_9 = arith.constant 0 : index
    %c0_10 = arith.constant 0 : index
    %12 = vector.load %arg4[%c0_9, %c0_10] : memref<32x32xbf16, #tpu.memory_space<vmem>>, vector<32x32xbf16>
    %cst_11 = arith.constant dense<0.000000e+00> : vector<2x32xf32>
    %13 = tpu.matmul %11, %12, %cst_11 {dimension_numbers = #tpu.dot_dimension_numbers<[1], [0], [0], [1], [0, 0, 1, 1], [], []>} : vector<2x32xbf16>, vector<32x32xbf16>, vector<2x32xf32> -> vector<2x32xf32>
    %c0_12 = arith.constant 0 : index
    %c0_13 = arith.constant 0 : index
    %14 = vector.load %arg5[%c0_12, %c0_13] : memref<1x32xf32, #tpu.memory_space<vmem>>, vector<1x32xf32>
    %15 = vector.broadcast %14 : vector<1x32xf32> to vector<2x32xf32>
    %16 = arith.addf %13, %15 : vector<2x32xf32>
    %17 = arith.truncf %16 : vector<2x32xf32> to vector<2x32xbf16>
    %c0_14 = arith.constant 0 : index
    %c0_15 = arith.constant 0 : index
    %18 = vector.load %arg6[%c0_14, %c0_15] : memref<32x32xbf16, #tpu.memory_space<vmem>>, vector<32x32xbf16>
    %cst_16 = arith.constant dense<0.000000e+00> : vector<2x32xf32>
    %19 = tpu.matmul %17, %18, %cst_16 {dimension_numbers = #tpu.dot_dimension_numbers<[1], [0], [0], [1], [0, 0, 1, 1], [], []>} : vector<2x32xbf16>, vector<32x32xbf16>, vector<2x32xf32> -> vector<2x32xf32>
    %c0_17 = arith.constant 0 : index
    %c0_18 = arith.constant 0 : index
    %20 = vector.load %arg7[%c0_17, %c0_18] : memref<1x32xf32, #tpu.memory_space<vmem>>, vector<1x32xf32>
    %21 = vector.broadcast %20 : vector<1x32xf32> to vector<2x32xf32>
    %22 = arith.addf %19, %21 : vector<2x32xf32>
    %cst_19 = arith.constant 0.000000e+00 : f32
    %23 = vector.broadcast %cst_19 : f32 to vector<2x32xf32>
    %24 = arith.maximumf %22, %23 : vector<2x32xf32>
    %25 = arith.truncf %24 : vector<2x32xf32> to vector<2x32xbf16>
    %c0_20 = arith.constant 0 : index
    %c0_21 = arith.constant 0 : index
    %26 = vector.load %arg8[%c0_20, %c0_21] : memref<32x16xbf16, #tpu.memory_space<vmem>>, vector<32x16xbf16>
    %cst_22 = arith.constant dense<0.000000e+00> : vector<2x16xf32>
    %27 = tpu.matmul %25, %26, %cst_22 {dimension_numbers = #tpu.dot_dimension_numbers<[1], [0], [0], [1], [0, 0, 1, 1], [], []>} : vector<2x32xbf16>, vector<32x16xbf16>, vector<2x16xf32> -> vector<2x16xf32>
    %c0_23 = arith.constant 0 : index
    %c0_24 = arith.constant 0 : index
    %28 = vector.load %arg9[%c0_23, %c0_24] : memref<1x16xf32, #tpu.memory_space<vmem>>, vector<1x16xf32>
    %29 = vector.broadcast %28 : vector<1x16xf32> to vector<2x16xf32>
    %30 = arith.addf %27, %29 : vector<2x16xf32>
    %cst_25 = arith.constant dense<0.000000e+00> : vector<16xf32>
    %31 = vector.multi_reduction <add>, %30, %cst_25 [0] : vector<2x16xf32> to vector<16xf32>
    %32 = vector.shape_cast %31 : vector<16xf32> to vector<1x16xf32>
    %cst_26 = arith.constant 2.000000e+00 : f32
    %33 = vector.broadcast %cst_26 : f32 to vector<1x16xf32>
    %34 = arith.divf %32, %33 : vector<1x16xf32>
    %35 = vector.broadcast %34 : vector<1x16xf32> to vector<2x16xf32>
    %36 = arith.subf %30, %35 : vector<2x16xf32>
    %37 = arith.mulf %36, %36 : vector<2x16xf32>
    %cst_27 = arith.constant dense<0.000000e+00> : vector<16xf32>
    %38 = vector.multi_reduction <add>, %37, %cst_27 [0] : vector<2x16xf32> to vector<16xf32>
    %39 = vector.shape_cast %38 : vector<16xf32> to vector<1x16xf32>
    %cst_28 = arith.constant 2.000000e+00 : f32
    %40 = vector.broadcast %cst_28 : f32 to vector<1x16xf32>
    %41 = arith.divf %39, %40 : vector<1x16xf32>
    %42 = vector.broadcast %34 : vector<1x16xf32> to vector<2x16xf32>
    %43 = arith.subf %30, %42 : vector<2x16xf32>
    %cst_29 = arith.constant 9.99999974E-6 : f32
    %44 = vector.broadcast %cst_29 : f32 to vector<1x16xf32>
    %45 = arith.addf %41, %44 : vector<1x16xf32>
    %46 = math.rsqrt %45 : vector<1x16xf32>
    %47 = vector.broadcast %46 : vector<1x16xf32> to vector<2x16xf32>
    %48 = arith.mulf %43, %47 : vector<2x16xf32>
    %c0_30 = arith.constant 0 : index
    %c0_31 = arith.constant 0 : index
    %49 = vector.load %arg10[%c0_30, %c0_31] : memref<1x16xf32, #tpu.memory_space<vmem>>, vector<1x16xf32>
    %50 = vector.broadcast %49 : vector<1x16xf32> to vector<2x16xf32>
    %51 = arith.mulf %50, %48 : vector<2x16xf32>
    %c0_32 = arith.constant 0 : index
    %c0_33 = arith.constant 0 : index
    %52 = vector.load %arg11[%c0_32, %c0_33] : memref<1x16xf32, #tpu.memory_space<vmem>>, vector<1x16xf32>
    %53 = vector.broadcast %52 : vector<1x16xf32> to vector<2x16xf32>
    %54 = arith.addf %51, %53 : vector<2x16xf32>
    %c0_34 = arith.constant 0 : index
    %c0_35 = arith.constant 0 : index
    %55 = vector.load %arg12[%c0_34, %c0_35] : memref<2x16xf32, #tpu.memory_space<vmem>>, vector<2x16xf32>
    tpu.vector_store %arg12[%c0_34, %c0_35], %54 {strides = array<i32>} : memref<2x16xf32, #tpu.memory_space<vmem>>, vector<2x16xf32>,
    return
  }
}

</mosaic_0001>

<bundles_post_ra>
// kernel: simclr_forward.1
= control target key start
LH: loop header
LB: loop body
LE: loop exit
PB: predicated region body
PF: predicated region fallthrough
CT: control target
= control target key end

     0   :  { %s1840_s0 = inlined_call_operand.vmem [shape: bf16[512,128], index: 0, kind: input, shape index: {}]   ;;  %s1841_s1 = inlined_call_operand.vmem [shape: bf16[2,512], index: 1, kind: input, shape index: {}]   ;;  %s1842_s2 = inlined_call_operand.vmem [shape: bf16[128,32], index: 2, kind: input, shape index: {}]   ;;  %s1843_s3 = inlined_call_operand.vmem [shape: f32[1,32], index: 3, kind: input, shape index: {}]   ;;  %s1844_s4 = inlined_call_operand.vmem [shape: bf16[32,32], index: 4, kind: input, shape index: {}]   ;;  %s1845_s5 = inlined_call_operand.vmem [shape: f32[1,32], index: 5, kind: input, shape index: {}]   ;;  %s1846_s6 = inlined_call_operand.vmem [shape: bf16[32,32], index: 6, kind: input, shape index: {}]   ;;  %s1847_s7 = inlined_call_operand.vmem [shape: f32[1,32], index: 7, kind: input, shape index: {}]   ;;  %s1848_s8 = inlined_call_operand.vmem [shape: bf16[32,16], index: 8, kind: input, shape index: {}]   ;;  %s1849_s9 = inlined_call_operand.vmem [shape: f32[1,16], index: 9, kind: input, shape index: {}]   ;;  %s1850_s10 = inlined_call_operand.vmem [shape: f32[1,16], index: 10, kind: input, shape index: {}]   ;;  %s1851_s11 = inlined_call_operand.vmem [shape: f32[1,16], index: 11, kind: input, shape index: {}]   ;;  %s1852_s12 = inlined_call_operand.hbm [shape: f32[2,16], index: 12, kind: output, shape index: {}]  }
   0x1   :  { %v1395_v0 = vld [vmem:[%s1842_s2] sm:$0xff]   ;;  %v1396_v1 = vld [vmem:[%s1842_s2 + $0x8] sm:$0xff]   ;;  %v1397_v2 = vld [vmem:[%s1842_s2 + $0x10] sm:$0xff]  }
   0x2   :  { %1271 = vmatprep.subr.bf16.mxu0 %v1395_v0  ;;  %1375 = vmatprep.subr.bf16.mxu1 %v1395_v0  ;;  %v1398_v3 = vld [vmem:[%s1842_s2 + $0x18] sm:$0xff]   ;;  %v1403_v4 = vld [vmem:[%s1840_s0] sm:$0xff]   ;;  %v1400_v6 = vld [vmem:[%s1842_s2 + $0x28] sm:$0xff]  }
   0x3   :  { %1272 = vmatpush3.bf16.msra.mxu0 %v1395_v0  ;;  %1383 = vmatpush3.bf16.msra.mxu1 %v1395_v0  ;;  %v1399_v5 = vld [vmem:[%s1842_s2 + $0x20] sm:$0xff]   ;;  %v1401_v7 = vld [vmem:[%s1842_s2 + $0x30] sm:$0xff]   ;;  %v1402_v8 = vld [vmem:[%s1842_s2 + $0x38] sm:$0xff]  }
   0x4   :  { %1273 = vmatprep.subr.bf16.mxu0 %v1396_v1  ;;  %1376 = vmatprep.subr.bf16.mxu1 %v1396_v1  ;;  %v1419_v9 = vld [vmem:[%s1840_s0 + $0xc0] sm:$0xff]   ;;  %v1404_v10 = vld [vmem:[%s1840_s0 + $0x8] sm:$0xff]   ;;  %v1405_v11 = vld [vmem:[%s1840_s0 + $0x10] sm:$0xff]  }
   0x5   :  { %1287 = vmatprep.mubr.bf16.mxu0 %v1403_v4  ;;  %1335 = vmatprep.mubr.bf16.mxu1 %v1419_v9  ;;  %v1420_v12 = vld [vmem:[%s1840_s0 + $0xc8] sm:$0xff]   ;;  %v1423_v13 = vld [vmem:[%s1840_s0 + $0xd0] sm:$0xff]   ;;  %v1406_v14 = vld [vmem:[%s1840_s0 + $0x18] sm:$0xff]  }
   0x6   :  { %v1407_v15 = vld [vmem:[%s1840_s0 + $0x20] sm:$0xff]   ;;  %v1424_v16 = vld [vmem:[%s1840_s0 + $0xd8] sm:$0xff]  }
   0x7   :  { %1274 = vmatpush3.bf16.msra.mxu0 %v1396_v1  ;;  %1384 = vmatpush3.bf16.msra.mxu1 %v1396_v1  ;;  %v1427_v17 = vld [vmem:[%s1840_s0 + $0xe0] sm:$0xff]  }
   0x8   :  { %1275 = vmatprep.subr.bf16.mxu0 %v1397_v2  ;;  %1377 = vmatprep.subr.bf16.mxu1 %v1397_v2 }
   0xb   :  { %1276 = vmatpush3.bf16.msra.mxu0 %v1397_v2  ;;  %1385 = vmatpush3.bf16.msra.mxu1 %v1397_v2 }
   0xc   :  { %1277 = vmatprep.subr.bf16.mxu0 %v1398_v3  ;;  %1378 = vmatprep.subr.bf16.mxu1 %v1398_v3 }
   0xf   :  { %1278 = vmatpush3.bf16.msra.mxu0 %v1398_v3  ;;  %1386 = vmatpush3.bf16.msra.mxu1 %v1398_v3 }
  0x10   :  { %1279 = vmatprep.subr.bf16.mxu0 %v1399_v5  ;;  %1379 = vmatprep.subr.bf16.mxu1 %v1399_v5 }
  0x13   :  { %1280 = vmatpush3.bf16.msra.mxu0 %v1399_v5  ;;  %1387 = vmatpush3.bf16.msra.mxu1 %v1399_v5 }
  0x14   :  { %1281 = vmatprep.subr.bf16.mxu0 %v1400_v6  ;;  %1380 = vmatprep.subr.bf16.mxu1 %v1400_v6 }
  0x17   :  { %1282 = vmatpush3.bf16.msra.mxu0 %v1400_v6  ;;  %1388 = vmatpush3.bf16.msra.mxu1 %v1400_v6 }
  0x18   :  { %1283 = vmatprep.subr.bf16.mxu0 %v1401_v7  ;;  %1381 = vmatprep.subr.bf16.mxu1 %v1401_v7 }
  0x1b   :  { %1284 = vmatpush3.bf16.msra.mxu0 %v1401_v7  ;;  %1389 = vmatpush3.bf16.msra.mxu1 %v1401_v7 }
  0x1c   :  { %1285 = vmatprep.subr.bf16.mxu0 %v1402_v8  ;;  %1382 = vmatprep.subr.bf16.mxu1 %v1402_v8 }
  0x1f   :  { %1286 = vmatpush3.bf16.msra.mxu0 %v1402_v8  ;;  %1390 = vmatpush3.bf16.msra.mxu1 %v1402_v8 }
  0x22   :  { %1288 = vmatmul.mubr.bf16.vlgmr.msra.gmra.mrb[0].mxu0 %v1404_v10  ;;  %1336 = vmatmul.mubr.bf16.vlgmr.msra.gmra.mrb[0].mxu1 %v1420_v12 }
  0x23   :  { %1291 = vmatprep.mubr.bf16.mxu0 %v1405_v11  ;;  %1339 = vmatprep.mubr.bf16.mxu1 %v1423_v13 }
  0x2a   :  { %1292 = vmatmul.mubr.bf16.gmra.mrb[4].mxu0 %v1406_v14  ;;  %1340 = vmatmul.mubr.bf16.gmra.mrb[4].mxu1 %v1424_v16 }
  0x2b   :  { %1295 = vmatprep.mubr.bf16.mxu0 %v1407_v15  ;;  %1343 = vmatprep.mubr.bf16.mxu1 %v1427_v17 }
  0x2c   :  { %17 = vsyncpa [#allocation3], 0  ;;  %v1408_v18 = vld [vmem:[%s1840_s0 + $0x28] sm:$0xff]   ;;  %v1409_v20 = vld [vmem:[%s1840_s0 + $0x30] sm:$0xff]   ;;  %v1467_v40 = vmov 1966171168   ;;  %v768_v42 = vlaneseq }
  0x2d   :  { %v1428_v19 = vld [vmem:[%s1840_s0 + $0xe8] sm:$0xff]   ;;  %v1431_v21 = vld [vmem:[%s1840_s0 + $0xf0] sm:$0xff]   ;;  %v1410_v22 = vld [vmem:[%s1840_s0 + $0x38] sm:$0xff]   ;;  %v766_v41 = vunpack.c.l.s4 %v1467_v40  ;;  %vm1469_vm0 = vmmov 0   ;;  %vm889_vm1 = vcmask 261120   ;;  %vm1068_vm2 = vcmask 123904  }
  0x2e   :  { %v1432_v23 = vld [vmem:[%s1840_s0 + $0xf8] sm:$0xff]   ;;  %v1411_v24 = vld [vmem:[%s1840_s0 + $0x40] sm:$0xff]   ;;  %v1412_v25 = vld [vmem:[%s1840_s0 + $0x48] sm:$0xff]   ;;  %v769_v44 = vshrl.u32 %v768_v42, 7  ;;  %s1470_s24 = smov [#allocation2]  }
  0x2f   :  { %v1413_v26 = vld [vmem:[%s1840_s0 + $0x50] sm:$0xff]   ;;  %v1414_v27 = vld [vmem:[%s1840_s0 + $0x58] sm:$0xff]   ;;  %v1415_v28 = vld [vmem:[%s1840_s0 + $0x60] sm:$0xff]   ;;  %v767_v43 = vunpack.c.0.s8 %v766_v41  ;;  %s1114_s25 = sshll.u32 %s1470_s24, 4  ;;  %s1115_s25 = int_to_ptr.vmem [resolvable:$true] %s1114_s25 }
  0x30   :  { %v1416_v29 = vld [vmem:[%s1840_s0 + $0x68] sm:$0xff]   ;;  %v1417_v30 = vld [vmem:[%s1840_s0 + $0x70] sm:$0xff]   ;;  %v1418_v31 = vld [vmem:[%s1840_s0 + $0x78] sm:$0xff]   ;;  %s1443_s26 = scalar_lea.vmem %s1115_s25, 32  ;;  %p1448_p1 = scmp.lt.s32.totalorder %s1115_s25, %s1115_s25 }
  0x31   :  { %v1421_v32 = vld [vmem:[%s1840_s0 + $0x80] sm:$0xff]   ;;  %v1422_v33 = vld [vmem:[%s1840_s0 + $0x88] sm:$0xff]   ;;  %v1425_v34 = vld [vmem:[%s1840_s0 + $0x90] sm:$0xff]   ;;  %v770_v47 = vsub.s32 %v767_v43, %v769_v44  ;;  %p1444_p0 = scmp.ne.s32.totalorder %s1115_s25, %s1443_s26  ;;  %p1449_p2 = scmp.lt.s32.totalorder %s1443_s26, %s1443_s26 }
  0x32   :  { %1296 = vmatmul.mubr.bf16.gmra.mrb[8].mxu0 %v1408_v18  ;;  %1344 = vmatmul.mubr.bf16.gmra.mrb[8].mxu1 %v1428_v19  ;;  %v1426_v35 = vld [vmem:[%s1840_s0 + $0x98] sm:$0xff]   ;;  %v1429_v36 = vld [vmem:[%s1840_s0 + $0xa0] sm:$0xff]   ;;  %v1430_v37 = vld [vmem:[%s1840_s0 + $0xa8] sm:$0xff]  }
  0x33   :  { %1299 = vmatprep.mubr.bf16.mxu0 %v1409_v20  ;;  %1347 = vmatprep.mubr.bf16.mxu1 %v1431_v21  ;;  %v1433_v38 = vld [vmem:[%s1840_s0 + $0xb0] sm:$0xff]   ;;  %v1434_v39 = vld [vmem:[%s1840_s0 + $0xb8] sm:$0xff]   ;;  %v1163_v45 = vld.sshfl [vmem:[%s1841_s1] sm:$0x33 pattern:$0x75316420]  ;;  %p1450_p3 = por %p1449_p2, %p1448_p1 }
  0x34   :  { %v764_v46 = vcombine.high %v1163_v45, %v1163_v45  ;;  %v1661_v49 = vrot.slane %v1163_v45, %v770_v47  ;;  %v1667_v50 = vld [vmem:[%s1843_s3] ss:$0 sm:$0xff] }
  0x35   :  { %p1451_p4 = pnand %p1450_p3, %p1444_p0 }
  0x36   :  { %v1659_v48 = vrot.slane %v764_v46, %v770_v47 }
  0x3a   :  { %1300 = vmatmul.mubr.bf16.gmra.mrb[12].mxu0 %v1410_v22  ;;  %1348 = vmatmul.mubr.bf16.gmra.mrb[12].mxu1 %v1432_v23 }
  0x3b   :  { %1303 = vmatprep.mubr.bf16.mxu0 %v1411_v24  ;;  %817 = vmatprep.mubr.bf16.mxu1 %v1659_v48 }
  0x42   :  { %1304 = vmatmul.mubr.bf16.gmra.mrb[16].mxu0 %v1412_v25 }
  0x43   :  { %1307 = vmatprep.mubr.bf16.mxu0 %v1413_v26 }
  0x4a   :  { %1308 = vmatmul.mubr.bf16.gmra.mrb[20].mxu0 %v1414_v27 }
  0x4b   :  { %1311 = vmatprep.mubr.bf16.mxu0 %v1415_v28 }
  0x52   :  { %1312 = vmatmul.mubr.bf16.gmra.mrb[24].mxu0 %v1416_v29 }
  0x53   :  { %1315 = vmatprep.mubr.bf16.mxu0 %v1417_v30 }
  0x5a   :  { %1316 = vmatmul.mubr.bf16.gmra.mrb[28].mxu0 %v1418_v31 }
  0x5b   :  { %1319 = vmatprep.mubr.bf16.mxu0 %v1421_v32 }
  0x62   :  { %1320 = vmatmul.mubr.bf16.gmra.mrb[32].mxu0 %v1422_v33 }
  0x63   :  { %1323 = vmatprep.mubr.bf16.mxu0 %v1425_v34 }
  0x6a   :  { %1324 = vmatmul.mubr.bf16.gmra.mrb[36].mxu0 %v1426_v35 }
  0x6b   :  { %1327 = vmatprep.mubr.bf16.mxu0 %v1429_v36 }
  0x72   :  { %1328 = vmatmul.mubr.bf16.gmra.mrb[40].mxu0 %v1430_v37 }
  0x73   :  { %1331 = vmatprep.mubr.bf16.mxu0 %v1433_v38 }
  0x7a   :  { %1332 = vmatmul.mubr.bf16.gmra.mrb[44].mxu0 %v1434_v39 }
  0xf5   :  { %v1289_v51 = vpop.f32.mrb[0].mxu0  ;;  %v1337_v52 = vpop.f32.mrb[0].mxu1 }
  0xf6   :  { %v413_v53 = vadd.f32 %v1289_v51, %v1667_v50  ;;  %v404_v54 = vpop.f32.mrb[1].mxu0  ;;  %v605_v55 = vadd.f32 %v1337_v52, %v1667_v50  ;;  %v596_v56 = vpop.f32.mrb[1].mxu1 }
  0xf7   :  { %v405_v57 = vadd.f32 %v1667_v50, %v404_v54  ;;  %v1290_v58 = vpop.f32.mrb[2].mxu0  ;;  %v597_v59 = vadd.f32 %v1667_v50, %v596_v56  ;;  %v1338_v60 = vpop.f32.mrb[2].mxu1 }
  0xf8   :  { %v416_v61 = vadd.f32 %v1290_v58, %v1667_v50  ;;  %v407_v62 = vpop.f32.mrb[3].mxu0  ;;  %v709_v63 = vmax.f32 %v605_v55, 0.0  ;;  %v608_v0 = vadd.f32 %v1338_v60, %v1667_v50  ;;  %v599_v1 = vpop.f32.mrb[3].mxu1  ;;  %v661_v5 = vmax.f32 %v413_v53, 0.0 }
  0xf9   :  { %v408_v2 = vadd.f32 %v1667_v50, %v407_v62  ;;  %v707_v3 = vmax.f32 %v597_v59, 0.0  ;;  %v600_v4 = vadd.f32 %v1667_v50, %v599_v1  ;;  %v659_v8 = vmax.f32 %v405_v57, 0.0 }
  0xfa   :  { %v662_v6 = vmax.f32 %v416_v61, 0.0  ;;  %v710_v7 = vmax.f32 %v608_v0, 0.0 }
  0xfb   :  { %v660_v9 = vmax.f32 %v408_v2, 0.0  ;;  %v708_v10 = vmax.f32 %v600_v4, 0.0 }
  0xfc   :  { %v1677_v11 = vpack.c.bf16 %v662_v6, %v661_v5  ;;  %v1679_v12 = vpack.c.bf16 %v710_v7, %v709_v63 }
  0xfd   :  { %v1681_v13 = vpack.c.bf16 %v660_v9, %v659_v8  ;;  %v1293_v14 = vpop.f32.mrb[4].mxu0  ;;  %v1683_v15 = vpack.c.bf16 %v708_v10, %v707_v3  ;;  %v1341_v16 = vpop.f32.mrb[4].mxu1 }
  0xfe   :  { %v429_v17 = vadd.f32 %v1293_v14, %v1667_v50  ;;  %v420_v18 = vpop.f32.mrb[5].mxu0  ;;  %v621_v19 = vadd.f32 %v1341_v16, %v1667_v50  ;;  %v612_v20 = vpop.f32.mrb[5].mxu1 }
  0xff   :  { %v421_v21 = vadd.f32 %v1667_v50, %v420_v18  ;;  %v1294_v22 = vpop.f32.mrb[6].mxu0  ;;  %v613_v23 = vadd.f32 %v1667_v50, %v612_v20  ;;  %v1342_v24 = vpop.f32.mrb[6].mxu1 }
 0x100   :  { %v432_v25 = vadd.f32 %v1294_v22, %v1667_v50  ;;  %v423_v26 = vpop.f32.mrb[7].mxu0  ;;  %v713_v27 = vmax.f32 %v621_v19, 0.0  ;;  %v624_v28 = vadd.f32 %v1342_v24, %v1667_v50  ;;  %v615_v29 = vpop.f32.mrb[7].mxu1  ;;  %v665_v33 = vmax.f32 %v429_v17, 0.0 }
 0x101   :  { %v424_v30 = vadd.f32 %v1667_v50, %v423_v26  ;;  %v711_v31 = vmax.f32 %v613_v23, 0.0  ;;  %v616_v32 = vadd.f32 %v1667_v50, %v615_v29  ;;  %v663_v36 = vmax.f32 %v421_v21, 0.0 }
 0x102   :  { %v666_v34 = vmax.f32 %v432_v25, 0.0  ;;  %v714_v35 = vmax.f32 %v624_v28, 0.0 }
 0x103   :  { %v664_v37 = vmax.f32 %v424_v30, 0.0  ;;  %v712_v38 = vmax.f32 %v616_v32, 0.0 }
 0x104   :  { %v1693_v39 = vpack.c.bf16 %v666_v34, %v665_v33  ;;  %v1695_v40 = vpack.c.bf16 %v714_v35, %v713_v27 }
 0x105   :  { %v1697_v41 = vpack.c.bf16 %v664_v37, %v663_v36  ;;  %v1297_v42 = vpop.f32.mrb[8].mxu0  ;;  %v1699_v43 = vpack.c.bf16 %v712_v38, %v711_v31  ;;  %v1345_v44 = vpop.f32.mrb[8].mxu1 }
 0x106   :  { %v445_v45 = vadd.f32 %v1297_v42, %v1667_v50  ;;  %v436_v46 = vpop.f32.mrb[9].mxu0  ;;  %v637_v47 = vadd.f32 %v1345_v44, %v1667_v50  ;;  %v628_v51 = vpop.f32.mrb[9].mxu1 }
 0x107   :  { %v437_v52 = vadd.f32 %v1667_v50, %v436_v46  ;;  %v1298_v53 = vpop.f32.mrb[10].mxu0  ;;  %v629_v54 = vadd.f32 %v1667_v50, %v628_v51  ;;  %v1346_v55 = vpop.f32.mrb[10].mxu1 }
 0x108   :  { %v448_v56 = vadd.f32 %v1298_v53, %v1667_v50  ;;  %v439_v57 = vpop.f32.mrb[11].mxu0  ;;  %v717_v58 = vmax.f32 %v637_v47, 0.0  ;;  %v640_v59 = vadd.f32 %v1346_v55, %v1667_v50  ;;  %v631_v60 = vpop.f32.mrb[11].mxu1  ;;  %v669_v0 = vmax.f32 %v445_v45, 0.0 }
 0x109   :  { %v440_v61 = vadd.f32 %v1667_v50, %v439_v57  ;;  %v715_v62 = vmax.f32 %v629_v54, 0.0  ;;  %v632_v63 = vadd.f32 %v1667_v50, %v631_v60  ;;  %v667_v3 = vmax.f32 %v437_v52, 0.0 }
 0x10a   :  { %v670_v1 = vmax.f32 %v448_v56, 0.0  ;;  %v718_v2 = vmax.f32 %v640_v59, 0.0 }
 0x10b   :  { %v668_v4 = vmax.f32 %v440_v61, 0.0  ;;  %v716_v5 = vmax.f32 %v632_v63, 0.0 }
 0x10c   :  { %v1709_v6 = vpack.c.bf16 %v670_v1, %v669_v0  ;;  %v1711_v7 = vpack.c.bf16 %v718_v2, %v717_v58 }
 0x10d   :  { %v1713_v8 = vpack.c.bf16 %v668_v4, %v667_v3  ;;  %v1301_v9 = vpop.f32.mrb[12].mxu0  ;;  %v1715_v10 = vpack.c.bf16 %v716_v5, %v715_v62  ;;  %v1349_v14 = vpop.f32.mrb[12].mxu1 }
 0x10e   :  { %v461_v16 = vadd.f32 %v1301_v9, %v1667_v50  ;;  %v452_v17 = vpop.f32.mrb[13].mxu0  ;;  %v653_v18 = vadd.f32 %v1349_v14, %v1667_v50  ;;  %v644_v19 = vpop.f32.mrb[13].mxu1 }
 0x10f   :  { %v453_v20 = vadd.f32 %v1667_v50, %v452_v17  ;;  %v1302_v21 = vpop.f32.mrb[14].mxu0  ;;  %v645_v22 = vadd.f32 %v1667_v50, %v644_v19  ;;  %v1350_v23 = vpop.f32.mrb[14].mxu1 }
 0x110   :  { %v464_v24 = vadd.f32 %v1302_v21, %v1667_v50  ;;  %v455_v25 = vpop.f32.mrb[15].mxu0  ;;  %v721_v26 = vmax.f32 %v653_v18, 0.0  ;;  %v656_v27 = vadd.f32 %v1350_v23, %v1667_v50  ;;  %v647_v28 = vpop.f32.mrb[15].mxu1  ;;  %v673_v32 = vmax.f32 %v461_v16, 0.0 }
 0x111   :  { %v456_v29 = vadd.f32 %v1667_v50, %v455_v25  ;;  %v719_v30 = vmax.f32 %v645_v22, 0.0  ;;  %v648_v31 = vadd.f32 %v1667_v50, %v647_v28  ;;  %v671_v35 = vmax.f32 %v453_v20, 0.0 }
 0x112   :  { %v674_v33 = vmax.f32 %v464_v24, 0.0  ;;  %v722_v34 = vmax.f32 %v656_v27, 0.0 }
 0x113   :  { %v672_v36 = vmax.f32 %v456_v29, 0.0  ;;  %v720_v37 = vmax.f32 %v648_v31, 0.0 }
 0x114   :  { %v1725_v38 = vpack.c.bf16 %v674_v33, %v673_v32  ;;  %v1727_v42 = vpack.c.bf16 %v722_v34, %v721_v26 }
 0x115   :  { %v1729_v44 = vpack.c.bf16 %v672_v36, %v671_v35  ;;  %v1305_v45 = vpop.f32.mrb[16].mxu0  ;;  %v1731_v46 = vpack.c.bf16 %v720_v37, %v719_v30 }
 0x116   :  { %v477_v47 = vadd.f32 %v1305_v45, %v1667_v50  ;;  %v468_v51 = vpop.f32.mrb[17].mxu0 }
 0x117   :  { %v469_v52 = vadd.f32 %v1667_v50, %v468_v51  ;;  %v1306_v53 = vpop.f32.mrb[18].mxu0 }
 0x118   :  { %v480_v54 = vadd.f32 %v1306_v53, %v1667_v50  ;;  %v471_v55 = vpop.f32.mrb[19].mxu0  ;;  %v677_v57 = vmax.f32 %v477_v47, 0.0 }
 0x119   :  { %v472_v56 = vadd.f32 %v1667_v50, %v471_v55  ;;  %v675_v59 = vmax.f32 %v469_v52, 0.0 }
 0x11a   :  { %v678_v58 = vmax.f32 %v480_v54, 0.0 }
 0x11b   :  { %v676_v60 = vmax.f32 %v472_v56, 0.0 }
 0x11c   :  { %v733_v61 = vpack.c.bf16 %v678_v58, %v677_v57 }
 0x11d   :  { %v732_v62 = vpack.c.bf16 %v676_v60, %v675_v59  ;;  %v1309_v63 = vpop.f32.mrb[20].mxu0 }
 0x11e   :  { %v493_v0 = vadd.f32 %v1309_v63, %v1667_v50  ;;  %v484_v1 = vpop.f32.mrb[21].mxu0 }
 0x11f   :  { %v485_v2 = vadd.f32 %v1667_v50, %v484_v1  ;;  %v1310_v3 = vpop.f32.mrb[22].mxu0  ;;  %1218 = vmatprep.subr.bf16.mxu1 %v732_v62 }
 0x120   :  { %v496_v4 = vadd.f32 %v1310_v3, %v1667_v50  ;;  %v487_v5 = vpop.f32.mrb[23].mxu0  ;;  %1219 = vmatpush3.bf16.msra.mxu1 %v1681_v13  ;;  %v681_v14 = vmax.f32 %v493_v0, 0.0  ;;  %v780_v3 = vcombine.high %v1659_v48, %v1659_v48 }
 0x121   :  { %v488_v9 = vadd.f32 %v1667_v50, %v487_v5  ;;  %1220 = vmatprep.subr.bf16.mxu1 %v733_v61  ;;  %v679_v17 = vmax.f32 %v485_v2, 0.0 }
 0x122   :  { %v682_v16 = vmax.f32 %v496_v4, 0.0 }
 0x123   :  { %v680_v18 = vmax.f32 %v488_v9, 0.0 }
 0x124   :  { %v735_v19 = vpack.c.bf16 %v682_v16, %v681_v14  ;;  %1221 = vmatpush3.bf16.msra.mxu1 %v1677_v11 }
 0x125   :  { %v734_v20 = vpack.c.bf16 %v680_v18, %v679_v17  ;;  %v1313_v21 = vpop.f32.mrb[24].mxu0 }
 0x126   :  { %v509_v22 = vadd.f32 %v1313_v21, %v1667_v50  ;;  %v500_v23 = vpop.f32.mrb[25].mxu0 }
 0x127   :  { %v501_v24 = vadd.f32 %v1667_v50, %v500_v23  ;;  %v1314_v25 = vpop.f32.mrb[26].mxu0  ;;  %1222 = vmatprep.subr.bf16.mxu1 %v734_v20 }
 0x128   :  { %v512_v13 = vadd.f32 %v1314_v25, %v1667_v50  ;;  %v503_v26 = vpop.f32.mrb[27].mxu0  ;;  %1223 = vmatpush3.bf16.msra.mxu1 %v1697_v41  ;;  %v685_v28 = vmax.f32 %v509_v22, 0.0 }
 0x129   :  { %v504_v27 = vadd.f32 %v1667_v50, %v503_v26  ;;  %1224 = vmatprep.subr.bf16.mxu1 %v735_v19  ;;  %v683_v11 = vmax.f32 %v501_v24, 0.0 }
 0x12a   :  { %v686_v29 = vmax.f32 %v512_v13, 0.0 }
 0x12b   :  { %v684_v30 = vmax.f32 %v504_v27, 0.0 }
 0x12c   :  { %v737_v31 = vpack.c.bf16 %v686_v29, %v685_v28  ;;  %1225 = vmatpush3.bf16.msra.mxu1 %v1693_v39 }
 0x12d   :  { %v736_v32 = vpack.c.bf16 %v684_v30, %v683_v11  ;;  %v1317_v33 = vpop.f32.mrb[28].mxu0 }
 0x12e   :  { %v525_v34 = vadd.f32 %v1317_v33, %v1667_v50  ;;  %v516_v35 = vpop.f32.mrb[29].mxu0 }
 0x12f   :  { %v517_v36 = vadd.f32 %v1667_v50, %v516_v35  ;;  %v1318_v37 = vpop.f32.mrb[30].mxu0  ;;  %1226 = vmatprep.subr.bf16.mxu1 %v736_v32 }
 0x130   :  { %v528_v41 = vadd.f32 %v1318_v37, %v1667_v50  ;;  %v519_v45 = vpop.f32.mrb[31].mxu0  ;;  %1227 = vmatpush3.bf16.msra.mxu1 %v1713_v8  ;;  %v689_v51 = vmax.f32 %v525_v34, 0.0 }
 0x131   :  { %v520_v47 = vadd.f32 %v1667_v50, %v519_v45  ;;  %1228 = vmatprep.subr.bf16.mxu1 %v737_v31  ;;  %v687_v39 = vmax.f32 %v517_v36, 0.0 }
 0x132   :  { %v690_v52 = vmax.f32 %v528_v41, 0.0 }
 0x133   :  { %v688_v53 = vmax.f32 %v520_v47, 0.0 }
 0x134   :  { %v739_v54 = vpack.c.bf16 %v690_v52, %v689_v51  ;;  %1229 = vmatpush3.bf16.msra.mxu1 %v1709_v6 }
 0x135   :  { %v738_v55 = vpack.c.bf16 %v688_v53, %v687_v39  ;;  %v1321_v56 = vpop.f32.mrb[32].mxu0 }
 0x136   :  { %v541_v57 = vadd.f32 %v1321_v56, %v1667_v50  ;;  %v532_v58 = vpop.f32.mrb[33].mxu0 }
 0x137   :  { %v533_v59 = vadd.f32 %v1667_v50, %v532_v58  ;;  %v1322_v60 = vpop.f32.mrb[34].mxu0  ;;  %1230 = vmatprep.subr.bf16.mxu1 %v738_v55  ;;  %v1468_v55 = vmov 0.0  }
 0x138   :  { %v693_v8 = vmax.f32 %v541_v57, 0.0  ;;  %v544_v61 = vadd.f32 %v1322_v60, %v1667_v50  ;;  %v535_v62 = vpop.f32.mrb[35].mxu0  ;;  %1231 = vmatpush3.bf16.msra.mxu1 %v1729_v44 }
 0x139   :  { %v536_v63 = vadd.f32 %v1667_v50, %v535_v62  ;;  %1232 = vmatprep.subr.bf16.mxu1 %v739_v54  ;;  %v691_v6 = vmax.f32 %v533_v59, 0.0  ;;  %v779_v54 = vcombine.high %v1661_v49, %v1661_v49 }
 0x13a   :  { %v694_v0 = vmax.f32 %v544_v61, 0.0 }
 0x13b   :  { %v692_v1 = vmax.f32 %v536_v63, 0.0  ;;  %v1437_v63 = vld [vmem:[%s1846_s6] sm:$0xff]  }
 0x13c   :  { %v741_v2 = vpack.c.bf16 %v694_v0, %v693_v8  ;;  %1233 = vmatpush3.bf16.msra.mxu1 %v1725_v38 }
 0x13d   :  { %v740_v4 = vpack.c.bf16 %v692_v1, %v691_v6  ;;  %v1325_v5 = vpop.f32.mrb[36].mxu0  ;;  %1240 = vmatprep.subr.bf16.mxu1 %v1683_v15  ;;  %v1438_v6 = vld [vmem:[%s1846_s6 + $0x8] sm:$0xff]   ;;  %v1164_v1 = vld [vmem:[%s1845_s5] ss:$0 sm:$0xff] }
 0x13e   :  { %v557_v9 = vadd.f32 %v1325_v5, %v1667_v50  ;;  %v548_v14 = vpop.f32.mrb[37].mxu0 }
 0x13f   :  { %v549_v44 = vadd.f32 %v1667_v50, %v548_v14  ;;  %v1326_v16 = vpop.f32.mrb[38].mxu0  ;;  %818 = vmatmul.mubr.bf16.vlgmr.msra.gmra.mrb[16].mxu1 %v1661_v49 }
 0x140   :  { %v697_v17 = vmax.f32 %v557_v9, 0.0  ;;  %v560_v18 = vadd.f32 %v1326_v16, %v1667_v50  ;;  %v551_v19 = vpop.f32.mrb[39].mxu0  ;;  %1241 = vmatpush3.bf16.msra.mxu1 %v740_v4  ;;  %857 = vmatprep.mubr.bf16.mxu1 %v780_v3  ;;  %v1439_v9 = vld [vmem:[%s1848_s8] sm:$0xff]   ;;  %v1440_v16 = vld [vmem:[%s1848_s8 + $0x8] sm:$0xff]  }
 0x141   :  { %v552_v48 = vadd.f32 %v1667_v50, %v551_v19  ;;  %1242 = vmatprep.subr.bf16.mxu1 %v1679_v12  ;;  %v695_v15 = vmax.f32 %v549_v44, 0.0 }
 0x142   :  { %v698_v38 = vmax.f32 %v560_v18, 0.0 }
 0x143   :  { %v696_v20 = vmax.f32 %v552_v48, 0.0 }
 0x144   :  { %v743_v21 = vpack.c.bf16 %v698_v38, %v697_v17  ;;  %1243 = vmatpush3.bf16.msra.mxu1 %v741_v2  ;;  %v1168_v17 = vld [vmem:[%s1847_s7] ss:$0 sm:$0xff] }
 0x145   :  { %v742_v22 = vpack.c.bf16 %v696_v20, %v695_v15  ;;  %v1329_v23 = vpop.f32.mrb[40].mxu0  ;;  %1244 = vmatprep.subr.bf16.mxu1 %v1699_v43 }
 0x146   :  { %v573_v24 = vadd.f32 %v1329_v23, %v1667_v50  ;;  %v564_v25 = vpop.f32.mrb[41].mxu0 }
 0x147   :  { %v565_v13 = vadd.f32 %v1667_v50, %v564_v25  ;;  %v1330_v26 = vpop.f32.mrb[42].mxu0 }
 0x148   :  { %v701_v27 = vmax.f32 %v573_v24, 0.0  ;;  %v576_v28 = vadd.f32 %v1330_v26, %v1667_v50  ;;  %v567_v29 = vpop.f32.mrb[43].mxu0  ;;  %1245 = vmatpush3.bf16.msra.mxu1 %v742_v22  ;;  %v1172_v22 = vld [vmem:[%s1849_s9] ss:$0 sm:$0xff] }
 0x149   :  { %v568_v12 = vadd.f32 %v1667_v50, %v567_v29  ;;  %1246 = vmatprep.subr.bf16.mxu1 %v1695_v40  ;;  %v699_v30 = vmax.f32 %v565_v13, 0.0 }
 0x14a   :  { %v702_v11 = vmax.f32 %v576_v28, 0.0 }
 0x14b   :  { %v700_v31 = vmax.f32 %v568_v12, 0.0 }
 0x14c   :  { %v745_v32 = vpack.c.bf16 %v702_v11, %v701_v27  ;;  %1247 = vmatpush3.bf16.msra.mxu1 %v743_v21 }
 0x14d   :  { %v744_v43 = vpack.c.bf16 %v700_v31, %v699_v30  ;;  %v1333_v33 = vpop.f32.mrb[44].mxu0  ;;  %1248 = vmatprep.subr.bf16.mxu1 %v1715_v10 }
 0x14e   :  { %v589_v34 = vadd.f32 %v1333_v33, %v1667_v50  ;;  %v580_v35 = vpop.f32.mrb[45].mxu0 }
 0x14f   :  { %v581_v36 = vadd.f32 %v1667_v50, %v580_v35  ;;  %v1334_v37 = vpop.f32.mrb[46].mxu0 }
 0x150   :  { %v705_v41 = vmax.f32 %v589_v34, 0.0  ;;  %v592_v45 = vadd.f32 %v1334_v37, %v1667_v50  ;;  %v583_v47 = vpop.f32.mrb[47].mxu0  ;;  %1249 = vmatpush3.bf16.msra.mxu1 %v744_v43 }
 0x151   :  { %v584_v40 = vadd.f32 %v1667_v50, %v583_v47  ;;  %1250 = vmatprep.subr.bf16.mxu1 %v1711_v7  ;;  %v703_v52 = vmax.f32 %v581_v36, 0.0  ;;  %v1435_v50 = vld [vmem:[%s1844_s4] sm:$0xff]   ;;  %v1436_v7 = vld [vmem:[%s1844_s4 + $0x8] sm:$0xff]  }
 0x152   :  { %v706_v51 = vmax.f32 %v592_v45, 0.0 }
 0x153   :  { %v704_v39 = vmax.f32 %v584_v40, 0.0 }
 0x154   :  { %v747_v53 = vpack.c.bf16 %v706_v51, %v705_v41  ;;  %1251 = vmatpush3.bf16.msra.mxu1 %v745_v32 }
 0x155   :  { %v746_v10 = vpack.c.bf16 %v704_v39, %v703_v52  ;;  %1252 = vmatprep.subr.bf16.mxu1 %v1731_v46  ;;  %v1176_v39 = vld [vmem:[%s1850_s10] ss:$0 sm:$0xff] }
 0x158   :  { %1253 = vmatpush3.bf16.msra.mxu1 %v746_v10  ;;  %v1177_v10 = vld [vmem:[%s1851_s11] ss:$0 sm:$0xff] }
 0x159   :  { %1254 = vmatprep.subr.bf16.mxu1 %v1727_v42 }
 0x15c   :  { %1255 = vmatpush3.bf16.msra.mxu1 %v747_v53 }
 0x15d   :  { %1351 = vmatprep.subr.bf16.mxu1 %v1468_v55 }
 0x15f   :  { %858 = vmatmul.mubr.bf16.vlgmr.msra.gmra.mrb[20].mxu1 %v779_v54 }
 0x160   :  { %1352 = vmatpush3.bf16.msra.mxu1 %v1435_v50  ;;  %1355 = vmatprep.mubr.msk.bf16.mxu1 %vm1469_vm0, %v1468_v55 }
 0x161   :  { %1353 = vmatprep.subr.bf16.mxu1 %v1468_v55 }
 0x164   :  { %1354 = vmatpush3.bf16.msra.mxu1 %v1436_v7 }
 0x165   :  { %1359 = vmatprep.subr.bf16.mxu1 %v1468_v55 }
 0x212   :  { %v1234_v49 = vpop.f32.mrb[16].mxu1 }
 0x213   :  { %v1235_v42 = vpop.f32.mrb[17].mxu1 }
 0x214   :  { %v1236_v46 = vadd.f32 %v1235_v42, %v1234_v49  ;;  %v1237_v56 = vpop.f32.mrb[18].mxu1 }
 0x215   :  { %v1238_v57 = vpop.f32.mrb[19].mxu1 }
 0x232   :  { %v1256_v58 = vpop.f32.mrb[20].mxu1 }
 0x233   :  { %v1257_v59 = vpop.f32.mrb[21].mxu1 }
 0x234   :  { %v1258_v60 = vadd.f32 %v1257_v59, %v1256_v58  ;;  %v1259_v8 = vpop.f32.mrb[22].mxu1 }
 0x235   :  { %v1260_v61 = vpop.f32.mrb[23].mxu1 }
 0x236   :  { %v860_v62 = vadd.f32 %v1258_v60, %v1236_v46 }
 0x238   :  { %v865_v0 = vpack.c.bf16 %v860_v62, %v860_v62 }
 0x23a   :  { %1356 = vmatmul.mubr.msk.bf16.vlgmr.msra.gmra.mrb[24].mxu1 %vm889_vm1, %v865_v0 }
 0x23b   :  { %1360 = vmatpush3.bf16.msra.mxu1 %v1437_v63  ;;  %1363 = vmatprep.mubr.msk.bf16.mxu1 %vm1469_vm0, %v1468_v55 }
 0x23c   :  { %1361 = vmatprep.subr.bf16.mxu1 %v1468_v55 }
 0x23f   :  { %1362 = vmatpush3.bf16.msra.mxu1 %v1438_v6 }
 0x240   :  { %1367 = vmatprep.subr.bf16.mxu1 %v1468_v55 }
 0x30d   :  { %v927_v2 = vpop.f32.mrb[24].mxu1 }
 0x30e   :  { %v928_v3 = vadd.f32 %v1164_v1, %v927_v2  ;;  %v1357_v4 = vpop.f32.mrb[25].mxu1 }
 0x30f   :  { %v930_v5 = vpop.f32.mrb[26].mxu1 }
 0x310   :  { %v933_v14 = vpack.c.bf16 %v928_v3, %v928_v3  ;;  %v1358_v44 = vpop.f32.mrb[27].mxu1 }
 0x312   :  { %1364 = vmatmul.mubr.msk.bf16.vlgmr.msra.gmra.mrb[28].mxu1 %vm889_vm1, %v933_v14 }
 0x313   :  { %1368 = vmatpush3.bf16.msra.mxu1 %v1439_v9  ;;  %1371 = vmatprep.mubr.msk.bf16.mxu1 %vm1469_vm0, %v1468_v55 }
 0x314   :  { %1369 = vmatprep.subr.bf16.mxu1 %v1468_v55 }
 0x317   :  { %1370 = vmatpush3.bf16.msra.mxu1 %v1440_v16 }
 0x3e5   :  { %v994_v18 = vpop.f32.mrb[28].mxu1 }
 0x3e6   :  { %v995_v19 = vadd.f32 %v1168_v17, %v994_v18  ;;  %v1365_v48 = vpop.f32.mrb[29].mxu1 }
 0x3e7   :  { %v997_v38 = vpop.f32.mrb[30].mxu1 }
 0x3e8   :  { %v1000_v15 = vmax.f32 %v995_v19, 0.0  ;;  %v1366_v20 = vpop.f32.mrb[31].mxu1 }
 0x3ea   :  { %v1001_v21 = vpack.c.bf16 %v1000_v15, %v1000_v15 }
 0x3ec   :  { %1372 = vmatmul.mubr.msk.bf16.vlgmr.msra.gmra.mrb[32].mxu1 %vm889_vm1, %v1001_v21 }
 0x4bf   :  { %v1062_v23 = vpop.f32.mrb[32].mxu1 }
 0x4c0   :  { %v1063_v24 = vadd.f32 %v1172_v22, %v1062_v23  ;;  %v1373_v25 = vpop.f32.mrb[33].mxu1 }
 0x4c1   :  { %v1065_v13 = vpop.f32.mrb[34].mxu1 }
 0x4c2   :  { %v1069_v26 = vsel %vm1068_vm2, %v1063_v24, 0.0  ;;  %v1374_v27 = vpop.f32.mrb[35].mxu1 }
 0x4c3   :  { %v1070_v28 = vrot.slane %v1069_v26, 4 }
 0x4c5   :  { %v1071_v29 = vadd.f32 %v1070_v28, %v1069_v26 }
 0x4c7   :  { %v1072_v12 = vrot.slane %v1071_v29, 2 }
 0x4c9   :  { %v1073_v11 = vadd.f32 %v1072_v12, %v1071_v29 }
 0x4cb   :  { %v1074_v30 = vrot.slane %v1073_v11, 1 }
 0x4cd   :  { %v1075_v31 = vadd.f32 %v1074_v30, %v1073_v11 }
 0x4cf   :  { %v1077_v32 = vmul.f32 0.5, %v1075_v31 }
 0x4d1   :  { %v1078_v43 = vsub.f32 %v1063_v24, %v1077_v32 }
 0x4d3   :  { %v1079_v33 = vmul.f32 %v1078_v43, %v1078_v43 }
 0x4d5   :  { %v1080_v34 = vsel %vm1068_vm2, %v1079_v33, 0.0 }
 0x4d6   :  { %v1081_v35 = vrot.slane %v1080_v34, 4 }
 0x4d8   :  { %v1082_v36 = vadd.f32 %v1081_v35, %v1080_v34 }
 0x4da   :  { %v1083_v37 = vrot.slane %v1082_v36, 2 }
 0x4dc   :  { %v1084_v41 = vadd.f32 %v1083_v37, %v1082_v36 }
 0x4de   :  { %v1085_v45 = vrot.slane %v1084_v41, 1 }
 0x4e0   :  { %v1086_v47 = vadd.f32 %v1085_v45, %v1084_v41 }
 0x4e2   :  { %v1087_v40 = vmul.f32 0.5, %v1086_v47 }
 0x4e4   :  { %v1088_v51 = vadd.f32 1e-05, %v1087_v40 }
 0x4e6   :  { %1441 = vrsqrt.f32 %v1088_v51 }
 0x4f0   :  { %v1442_v52 = vpop.eup %1441 }
 0x4f1   :  { %v1090_v53 = vmul.f32 %v1442_v52, %v1078_v43 }
 0x4f3   :  { %v1098_v54 = vmul.f32 %v1176_v39, %v1090_v53 }
 0x4f5   :  { %v1106_v55 = vadd.f32 %v1177_v10, %v1098_v54 }
 0x4f7   :  { %1107 = vst.msk [vmem:[#allocation2] sm:$0x3] %vm1068_vm2, %v1106_v55 }
 0x4f8   :  { %1454 = shalt.err (!%p1451_p4)
}
 0x4f9   :  { %s1455_s27 = scalar_lea.hbm %s1852_s12, 32 }
 0x4fa   :  { %p1456_p5 = scmp.ne.s32.totalorder %s1852_s12, %s1455_s27  ;;  %p1459_p6 = scmp.lt.u32.totalorder %s1455_s27, %s1852_s12 }
 0x4fc   :  { %p1461_p7 = pnand %p1459_p6, %p1456_p5 }
 0x4fe   :  { %1464 = shalt.err (!%p1461_p7)
}
 0x4ff   :  { %1117 = dma.vmem_to_hbm [thread:$0]  %s1115_s25, 32, %s1852_s12, [#allocation3]  }
 0x500   :  { %1465 = dma.done.wait [#allocation3], 32  }
 0x501   :  { %1466 = vsyncadd [#allocation3], 4294967264 }
 0x502   :  { %1121 = vsyncpa [#allocation3], 1 }

</bundles_post_ra>
